<compile_context>
chip_gen: v7x
topology: tpu7x:2x2x1
jax: 0.10.0
libtpu: 0.0.40
codegen_flags: <defaults>
</compile_context>

<pallas_src>
import functools

import jax
import jax.numpy as jnp
from jax.experimental import pallas as pl
from jax.experimental.pallas import tpu as pltpu


def _focal_loss_kernel(p_ref, t_ref, out_ref, acc_ref, *,
                       n_total, block_n, blocks_per_core, acc_h):
    c = pl.program_id(0)        # "parallel" axis (one slice per TensorCore on v7x)
    i = pl.program_id(1)        # "arbitrary" (reduction) axis

    @pl.when(i == 0)
    def _():
        acc_ref[...] = jnp.zeros_like(acc_ref)

    p = p_ref[...].astype(jnp.float32)      # (block_n, H, W) channel-1 probabilities
    t = t_ref[...]                          # (block_n, H, W) targets, native dtype

    # Binary {0,1} targets -> one vselect and a single log per element.
    # (PyTorch BCELoss also accepts soft targets in [0,1]; those would need the
    #  two-log form.  The original module feeds binary masks.)
    x = jnp.where(t > 0, p, 1.0 - p)

    # Ragged-tail / duplicate-block mask over the batch dim: force x -> 1.0 so the
    # log term is exactly 0 and OOB garbage never reaches the accumulator.
    n_start = (c * blocks_per_core + i) * block_n
    row = jax.lax.broadcasted_iota(jnp.int32, x.shape, 0)
    x = jnp.where(row + n_start < n_total, x, 1.0)

    # BCE element log term with PyTorch's -100 clamp.
    terms = jnp.maximum(jnp.log(x), -100.0)

    # Reduce to a small lane/sublane-parallel partial: reductions over leading
    # axes are pure VPU vreg adds (no XLU), and the tiny accumulator avoids the
    # big read-modify-write store stream of a (block_rows, W) accumulator.
    partial = terms.sum(axis=0)                               # (H, W)
    if acc_h != partial.shape[0]:                             # static: H % 8 == 0
        partial = partial.reshape(-1, acc_h, partial.shape[1]).sum(axis=0)
    acc_ref[...] += partial

    @pl.when(i == pl.num_programs(1) - 1)
    def _():
        # One cross-lane reduce per core; raw sum of the log terms.
        out_ref[0, 0] = jnp.sum(acc_ref[...])


def focal_loss(predictions, targets, gamma, *, block_elems=512 * 1024):
    """predictions: [N, C, H, W] probabilities; targets: [N, H, W] binary {0,1}."""
    N, C, H, W = predictions.shape
    if C < 2:
        raise ValueError("predictions must have at least 2 channels")
    count = N * H * W

    # ~512K elements (~4 MiB of p+t input) per grid step; ~8 MiB double-buffered.
    block_n = max(1, min(N, block_elems // (H * W)))
    total_blocks = pl.cdiv(N, block_n)
    n_par = 2 if total_blocks >= 2 else 1        # v7x: one parallel slice per TC
    blocks_per_core = pl.cdiv(total_blocks, n_par)

    acc_h = 8 if H % 8 == 0 else H

    kernel = functools.partial(_focal_loss_kernel, n_total=N, block_n=block_n,
                               blocks_per_core=blocks_per_core, acc_h=acc_h)

    def n_block(c, i):
        # Clamp: with an odd block count the second core's last step re-reads the
        # final block; the in-kernel mask zeroes its contribution.
        return jnp.minimum(c * blocks_per_core + i, total_blocks - 1)

    p_spec = pl.BlockSpec((block_n, pl.Squeezed(), H, W),
                          lambda c, i: (n_block(c, i), 1, 0, 0))   # pin channel 1
    t_spec = pl.BlockSpec((block_n, H, W),
                          lambda c, i: (n_block(c, i), 0, 0))

    partials = pl.pallas_call(
        kernel,
        out_shape=jax.ShapeDtypeStruct((n_par, 1), jnp.float32),
        grid_spec=pltpu.PrefetchScalarGridSpec(
            num_scalar_prefetch=0,
            grid=(n_par, blocks_per_core),
            in_specs=[p_spec, t_spec],
            out_specs=pl.BlockSpec((1, 1), lambda c, i: (c, 0),
                                   memory_space=pltpu.SMEM),
            scratch_shapes=[pltpu.VMEM((acc_h, W), jnp.float32)],
        ),
        compiler_params=pltpu.CompilerParams(
            dimension_semantics=("parallel", "arbitrary")),
        cost_estimate=pl.CostEstimate(
            flops=6 * count,
            transcendentals=count,               # one log per element
            bytes_accessed=count * (predictions.dtype.itemsize
                                    + targets.dtype.itemsize) + 4 * n_par,
        ),
    )(predictions, targets)

    # Tiny scalar epilogue: combine per-core partials + focal transform.
    bce = -jnp.sum(partials) / jnp.float32(count)
    bce_exp = jnp.exp(-bce)
    g = float(gamma)
    if g == 2.0:                                  # skip pow (exp+log) for the common case
        focal = (1.0 - bce_exp) * (1.0 - bce_exp)
    else:
        focal = (1.0 - bce_exp) ** g
    return focal * bce


def _reference_focal_loss(predictions, targets, gamma):
    p = predictions[:, 1].reshape(-1).astype(jnp.float32)
    t = targets.reshape(-1).astype(jnp.float32)
    log_p = jnp.maximum(jnp.log(p), -100.0)
    log_1mp = jnp.maximum(jnp.log(1.0 - p), -100.0)
    bce = jnp.mean(-(t * log_p + (1.0 - t) * log_1mp))
    return (1.0 - jnp.exp(-bce)) ** gamma * bce


if __name__ == "__main__":
    key = jax.random.PRNGKey(0)
    k1, k2, k3, k4 = jax.random.split(key, 4)

    gamma = 2.0

    # Primary config: small shapes consistent with the module's forward.
    N, C, H, W = 2, 2, 16, 16
    predictions = jax.random.uniform(k1, (N, C, H, W), jnp.float32,
                                     minval=1e-3, maxval=1.0 - 1e-3)
    targets = jax.random.bernoulli(k2, 0.5, (N, H, W)).astype(jnp.int32)

    focal_loss_jit = jax.jit(focal_loss, static_argnums=(2,))
    out = jax.block_until_ready(focal_loss_jit(predictions, targets, gamma))
    ref = _reference_focal_loss(predictions, targets, gamma)
    assert jnp.allclose(out, ref, rtol=1e-5, atol=1e-6), (out, ref)

    # Second config with tiny blocks to exercise the multi-block / dual-core /
    # clamped-duplicate-block masking path.
    N2 = 3
    predictions2 = jax.random.uniform(k3, (N2, C, H, W), jnp.float32,
                                      minval=1e-3, maxval=1.0 - 1e-3)
    targets2 = jax.random.bernoulli(k4, 0.5, (N2, H, W)).astype(jnp.int32)
    focal_loss_small = jax.jit(functools.partial(focal_loss, block_elems=H * W),
                               static_argnums=(2,))
    out2 = jax.block_until_ready(focal_loss_small(predictions2, targets2, gamma))
    ref2 = _reference_focal_loss(predictions2, targets2, gamma)
    assert jnp.allclose(out2, ref2, rtol=1e-5, atol=1e-6), (out2, ref2)

    print("KERNEL_OK")
</pallas_src>

<mosaic_0001>
module attributes {stable_mosaic.version = 11 : i64} {
  func.func @_focal_loss_kernel(%arg0: i32, %arg1: i32, %arg2: memref<2x1x16x16xf32, #tpu.memory_space<vmem>>, %arg3: memref<2x16x16xi32, #tpu.memory_space<vmem>>, %arg4: memref<1x1xf32, #tpu.memory_space<smem>>, %arg5: memref<8x16xf32, #tpu.memory_space<vmem>>) attributes {dimension_semantics = [#tpu.dimension_semantics<parallel>, #tpu.dimension_semantics<arbitrary>], iteration_bounds = array<i64: 1, 1>, scalar_prefetch = 0 : i64, scratch_operands = 1 : i64, tpu.core_type = #tpu.core_type<tc>, window_params = [{transform_indices = @transform_0, window_bounds = array<i64: 2, 1, 16, 16>}, {transform_indices = @transform_1, window_bounds = array<i64: 2, 16, 16>}, {transform_indices = @transform_2, window_bounds = array<i64: 1, 1>}]} {
    %c0_i32 = arith.constant 0 : i32
    %0 = arith.cmpi eq, %arg1, %c0_i32 : i32
    %1 = arith.extui %0 : i1 to i32
    %c0_i32_0 = arith.constant 0 : i32
    %2 = arith.cmpi ne, %1, %c0_i32_0 : i32
    scf.if %2 {
      %cst_19 = arith.constant 0.000000e+00 : f32
      %33 = vector.broadcast %cst_19 : f32 to vector<8x16xf32>
      %c0_20 = arith.constant 0 : index
      %c0_21 = arith.constant 0 : index
      %34 = vector.load %arg5[%c0_20, %c0_21] : memref<8x16xf32, #tpu.memory_space<vmem>>, vector<8x16xf32>
      tpu.vector_store %arg5[%c0_20, %c0_21], %33 {strides = array<i32>} : memref<8x16xf32, #tpu.memory_space<vmem>>, vector<8x16xf32>,
    } else {
    }
    %c0 = arith.constant 0 : index
    %c0_1 = arith.constant 0 : index
    %c0_2 = arith.constant 0 : index
    %c0_3 = arith.constant 0 : index
    %3 = vector.load %arg2[%c0, %c0_1, %c0_2, %c0_3] : memref<2x1x16x16xf32, #tpu.memory_space<vmem>>, vector<2x1x16x16xf32>
    %4 = vector.shape_cast %3 : vector<2x1x16x16xf32> to vector<2x16x16xf32>
    %c0_4 = arith.constant 0 : index
    %c0_5 = arith.constant 0 : index
    %c0_6 = arith.constant 0 : index
    %5 = vector.load %arg3[%c0_4, %c0_5, %c0_6] : memref<2x16x16xi32, #tpu.memory_space<vmem>>, vector<2x16x16xi32>
    %c0_i32_7 = arith.constant 0 : i32
    %6 = vector.broadcast %c0_i32_7 : i32 to vector<2x16x16xi32>
    %7 = arith.cmpi sgt, %5, %6 : vector<2x16x16xi32>
    %cst = arith.constant 1.000000e+00 : f32
    %8 = vector.broadcast %cst : f32 to vector<2x16x16xf32>
    %9 = arith.subf %8, %4 : vector<2x16x16xf32>
    %10 = arith.select %7, %4, %9 : vector<2x16x16xi1>, vector<2x16x16xf32>
    %c1_i32 = arith.constant 1 : i32
    %11 = arith.muli %arg0, %c1_i32 : i32
    %12 = arith.addi %11, %arg1 : i32
    %c2_i32 = arith.constant 2 : i32
    %13 = arith.muli %12, %c2_i32 : i32
    %14 = tpu.iota {dimensions = array<i32: 0>} : vector<2x16x16xi32>
    %15 = vector.broadcast %13 : i32 to vector<2x16x16xi32>
    %16 = arith.addi %14, %15 : vector<2x16x16xi32>
    %c2_i32_8 = arith.constant 2 : i32
    %17 = vector.broadcast %c2_i32_8 : i32 to vector<2x16x16xi32>
    %18 = arith.cmpi slt, %16, %17 : vector<2x16x16xi32>
    %cst_9 = arith.constant 1.000000e+00 : f32
    %19 = vector.broadcast %cst_9 : f32 to vector<2x16x16xf32>
    %20 = arith.select %18, %10, %19 : vector<2x16x16xi1>, vector<2x16x16xf32>
    %21 = math.log %20 : vector<2x16x16xf32>
    %cst_10 = arith.constant -1.000000e+02 : f32
    %22 = vector.broadcast %cst_10 : f32 to vector<2x16x16xf32>
    %23 = arith.maximumf %21, %22 : vector<2x16x16xf32>
    %cst_11 = arith.constant dense<0.000000e+00> : vector<16x16xf32>
    %24 = vector.multi_reduction <add>, %23, %cst_11 [0] : vector<2x16x16xf32> to vector<16x16xf32>
    %25 = vector.shape_cast %24 : vector<16x16xf32> to vector<2x8x16xf32>
    %cst_12 = arith.constant dense<0.000000e+00> : vector<8x16xf32>
    %26 = vector.multi_reduction <add>, %25, %cst_12 [0] : vector<2x8x16xf32> to vector<8x16xf32>
    %c0_13 = arith.constant 0 : index
    %c0_14 = arith.constant 0 : index
    %27 = vector.load %arg5[%c0_13, %c0_14] : memref<8x16xf32, #tpu.memory_space<vmem>>, vector<8x16xf32>
    %28 = arith.addf %27, %26 : vector<8x16xf32>
    %c0_15 = arith.constant 0 : index
    %c0_16 = arith.constant 0 : index
    %29 = vector.load %arg5[%c0_15, %c0_16] : memref<8x16xf32, #tpu.memory_space<vmem>>, vector<8x16xf32>
    tpu.vector_store %arg5[%c0_15, %c0_16], %28 {strides = array<i32>} : memref<8x16xf32, #tpu.memory_space<vmem>>, vector<8x16xf32>,
    %c0_i32_17 = arith.constant 0 : i32
    %30 = arith.cmpi eq, %arg1, %c0_i32_17 : i32
    %31 = arith.extui %30 : i1 to i32
    %c0_i32_18 = arith.constant 0 : i32
    %32 = arith.cmpi ne, %31, %c0_i32_18 : i32
    scf.if %32 {
      %c0_19 = arith.constant 0 : index
      %c0_20 = arith.constant 0 : index
      %33 = vector.load %arg5[%c0_19, %c0_20] : memref<8x16xf32, #tpu.memory_space<vmem>>, vector<8x16xf32>
      %34 = vector.shape_cast %33 : vector<8x16xf32> to vector<1x8x16xf32>
      %cst_21 = arith.constant dense<0.000000e+00> : vector<1xf32>
      %35 = vector.multi_reduction <add>, %34, %cst_21 [1, 2] : vector<1x8x16xf32> to vector<1xf32>
      %36 = vector.shape_cast %35 : vector<1xf32> to vector<1x1x1xf32>
      %37 = vector.extract %36[0, 0, 0] : f32 from vector<1x1x1xf32>
      %c0_22 = arith.constant 0 : index
      %c0_23 = arith.constant 0 : index
      %38 = memref.load %arg4[%c0_22, %c0_23] : memref<1x1xf32, #tpu.memory_space<smem>>
      memref.store %37, %arg4[%c0_22, %c0_23] : memref<1x1xf32, #tpu.memory_space<smem>>
    } else {
    }
    return
  }
  func.func @transform_0(%arg0: i32, %arg1: i32) -> (i32, i32, i32, i32) {
    %c1_i32 = arith.constant 1 : i32
    %0 = arith.muli %arg0, %c1_i32 : i32
    %1 = arith.addi %0, %arg1 : i32
    %c0_i32 = arith.constant 0 : i32
    %2 = arith.minsi %1, %c0_i32 : i32
    %c1_i32_0 = arith.constant 1 : i32
    %c0_i32_1 = arith.constant 0 : i32
    %c0_i32_2 = arith.constant 0 : i32
    %c0_i32_3 = arith.constant 0 : i32
    return %2, %c1_i32_0, %c0_i32_1, %c0_i32_2 : i32, i32, i32, i32
  }
  func.func @transform_1(%arg0: i32, %arg1: i32) -> (i32, i32, i32) {
    %c1_i32 = arith.constant 1 : i32
    %0 = arith.muli %arg0, %c1_i32 : i32
    %1 = arith.addi %0, %arg1 : i32
    %c0_i32 = arith.constant 0 : i32
    %2 = arith.minsi %1, %c0_i32 : i32
    %c0_i32_0 = arith.constant 0 : i32
    %c0_i32_1 = arith.constant 0 : i32
    %c0_i32_2 = arith.constant 0 : i32
    return %2, %c0_i32_0, %c0_i32_1 : i32, i32, i32
  }
  func.func @transform_2(%arg0: i32, %arg1: i32) -> (i32, i32) {
    %c0_i32 = arith.constant 0 : i32
    %c0_i32_0 = arith.constant 0 : i32
    return %arg0, %c0_i32 : i32, i32
  }
}

</mosaic_0001>

<bundles_post_ra>
// kernel: focal_loss.1
= control target key start
LH: loop header
LB: loop body
LE: loop exit
PB: predicated region body
PF: predicated region fallthrough
CT: control target
= control target key end

     0   :  { %7 = vsyncpa [#allocation4], 0  ;;  %s313_s0 = inlined_call_operand.hbm [shape: f32[2,2,16,16], index: 0, kind: input, shape index: {}]   ;;  %s314_s1 = inlined_call_operand.hbm [shape: s32[2,16,16], index: 1, kind: input, shape index: {}]   ;;  %s315_s2 = inlined_call_operand.hbm [shape: f32[1,1], index: 2, kind: output, shape index: {}]  }
   0x1   :  { %8 = vsyncpa [#allocation7], 0 }
   0x2   :  { %9 = vsyncpa [#allocation5], 0 }
   0x3   :  { %s183_s11 = scalar_lea.hbm %s313_s0, 256  ;;  %s27_s12 = sld [smem:[#allocation0]]  }
   0x4   :  { %s249_s13 = smov [#allocation3]   ;;  %s250_s15 = smov 512  }
   0x5   :  { %s35_s14 = sshll.u32 %s249_s13, 4  ;;  %42 = sst [smem:[#allocation10]] %s250_s15  ;;  %s36_s14 = int_to_ptr.vmem [resolvable:$true] %s35_s14 }
   0x6   :  { %s251_s16 = smov 256   ;;  %s252_s17 = smov 2  }
   0x7   :  { %44 = sst [smem:[#allocation10 + $0x1]] %s251_s16  ;;  %s253_s19 = smov 128  }
   0x8   :  { %46 = sst [smem:[#allocation10 + $0x2]] %s252_s17  ;;  %s254_s21 = smov 8  }
   0x9   :  { %s186_s18 = sshll.u32 %s27_s12, 26  ;;  %48 = sst [smem:[#allocation10 + $0x3]] %s253_s19 }
   0xa   :  { %s187_s20 = sadd.s32 134217728, %s186_s18  ;;  %50 = sst [smem:[#allocation10 + $0x4]] %s253_s19 }
   0xb   :  { %52 = sst [smem:[#allocation10 + $0x5]] %s254_s21  ;;  %s255_s22 = smov [#allocation4]  }
   0xc   :  { %s256_s23 = smov [#allocation9]   ;;  %s257_s0 = smov [#allocation6]  }
   0xd   :  { %54 = dma.general %s183_s11, 512, %s36_s14, %s255_s22, %s256_s23, [#allocation10], %s187_s20, 0  }
   0xe   :  { %s67_s24 = sshll.u32 %s257_s0, 4  ;;  %s211_s27 = scalar_lea.hbm %s314_s1, 512  ;;  %s68_s24 = int_to_ptr.vmem [resolvable:$true] %s67_s24 }
   0xf   :  { %p212_p0 = scmp.ne.s32.totalorder %s314_s1, %s211_s27  ;;  %p215_p1 = scmp.lt.u32.totalorder %s211_s27, %s314_s1 }
  0x11   :  { %p217_p2 = pnand %p215_p1, %p212_p0 }
  0x13   :  { %220 = shalt.err (!%p217_p2)
}
  0x14   :  { %s221_s4 = scalar_lea.vmem %s68_s24, 512  ;;  %p226_p4 = scmp.lt.s32.totalorder %s68_s24, %s68_s24 }
  0x15   :  { %p222_p3 = scmp.ne.s32.totalorder %s68_s24, %s221_s4  ;;  %p227_p5 = scmp.lt.s32.totalorder %s221_s4, %s221_s4 }
  0x17   :  { %p228_p6 = por %p227_p5, %p226_p4 }
  0x19   :  { %p229_p7 = pnand %p228_p6, %p222_p3 }
  0x1b   :  { %232 = shalt.err (!%p229_p7)
}
  0x1c   :  { %s258_s5 = smov 128   ;;  %s259_s6 = smov 8  }
  0x1d   :  { %73 = dma.hbm_to_vmem [thread:$0]  %s314_s1, 512, %s68_s24, [#allocation7], %s258_s5, %s258_s5, %s259_s6  }
  0x1e   :  { %243 = dma.done.wait [#allocation4], 512  }
  0x1f   :  { %244 = vsyncadd [#allocation4], 4294966784 }
  0x20   :  { %245 = dma.done.wait [#allocation7], 512  }
  0x21   :  { %246 = vsyncadd [#allocation7], 4294966784  ;;  %vm92_vm0 = vcmask 130048   ;;  %v260_v0 = vmov 0.0   ;;  %v94_v1 = vld [vmem:[#allocation3] sm:$0xff]  ;;  %v95_v2 = vld [vmem:[#allocation3 + $0x8] sm:$0xff] }
  0x22   :  { %93 = vst.msk [vmem:[#allocation2] sm:$0xff] %vm92_vm0, %v260_v0  ;;  %v96_v3 = vld [vmem:[#allocation3 + $0x10] sm:$0xff]  ;;  %v97_v4 = vld [vmem:[#allocation3 + $0x18] sm:$0xff]  ;;  %v98_v5 = vld [vmem:[#allocation6] sm:$0xff]  ;;  %v106_v7 = vsub.f32 1.0, %v94_v1  ;;  %v107_v8 = vsub.f32 1.0, %v95_v2 }
  0x23   :  { %v99_v6 = vld [vmem:[#allocation6 + $0x8] sm:$0xff]  ;;  %v108_v9 = vsub.f32 1.0, %v96_v3  ;;  %v100_v10 = vld [vmem:[#allocation6 + $0x10] sm:$0xff]  ;;  %v101_v11 = vld [vmem:[#allocation6 + $0x18] sm:$0xff]  ;;  %vm102_vm1 = vcmp.gt.s32.totalorder %v98_v5, 0  ;;  %v109_v12 = vsub.f32 1.0, %v97_v4 }
  0x24   :  { %vm103_vm2 = vcmp.gt.s32.totalorder %v99_v6, 0  ;;  %vm104_vm3 = vcmp.gt.s32.totalorder %v100_v10, 0  ;;  %vm105_vm4 = vcmp.gt.s32.totalorder %v101_v11, 0  ;;  %v110_v13 = vsel %vm102_vm1, %v94_v1, %v106_v7  ;;  %s233_s11 = scalar_lea.hbm %s315_s2, 16 }
  0x25   :  { %v111_v14 = vsel %vm103_vm2, %v95_v2, %v107_v8  ;;  %v112_v15 = vsel %vm104_vm3, %v96_v3, %v108_v9  ;;  %v113_v16 = vsel %vm105_vm4, %v97_v4, %v109_v12  ;;  %203 = vlog2.f32 %v110_v13  ;;  %p234_p8 = scmp.ne.s32.totalorder %s315_s2, %s233_s11  ;;  %p237_p9 = scmp.lt.u32.totalorder %s233_s11, %s315_s2 }
  0x26   :  { %205 = vlog2.f32 %v111_v14 }
  0x27   :  { %207 = vlog2.f32 %v112_v15  ;;  %p239_p10 = pnand %p237_p9, %p234_p8 }
  0x28   :  { %209 = vlog2.f32 %v113_v16 }
  0x29   :  { %v146_v37 = vld [vmem:[#allocation2] sm:$0xff] }
  0x2f   :  { %v204_v17 = vpop.eup %203 }
  0x30   :  { %v206_v18 = vpop.eup %205  ;;  %v125_v19 = vmul.f32 0.6931472, %v204_v17 }
  0x31   :  { %v208_v20 = vpop.eup %207  ;;  %v127_v21 = vmul.f32 0.6931472, %v206_v18 }
  0x32   :  { %v210_v22 = vpop.eup %209  ;;  %v129_v23 = vmul.f32 0.6931472, %v208_v20  ;;  %v132_v24 = vmax.f32 %v125_v19, -100.0 }
  0x33   :  { %v131_v25 = vmul.f32 0.6931472, %v210_v22  ;;  %v133_v26 = vmax.f32 %v127_v21, -100.0 }
  0x34   :  { %v134_v27 = vmax.f32 %v129_v23, -100.0  ;;  %v137_v28 = vsel %vm92_vm0, %v132_v24, 0.0 }
  0x35   :  { %v135_v29 = vmax.f32 %v131_v25, -100.0  ;;  %v140_v30 = vsel %vm92_vm0, %v133_v26, 0.0 }
  0x36   :  { %v138_v31 = vsel %vm92_vm0, %v134_v27, 0.0 }
  0x37   :  { %v139_v32 = vadd.f32 %v138_v31, %v137_v28  ;;  %v141_v33 = vsel %vm92_vm0, %v135_v29, 0.0 }
  0x38   :  { %v142_v34 = vadd.f32 %v141_v33, %v140_v30 }
  0x39   :  { %v143_v35 = vsel %vm92_vm0, %v139_v32, 0.0 }
  0x3a   :  { %v144_v36 = vsel %vm92_vm0, %v142_v34, 0.0 }
  0x3b   :  { %v145_v38 = vadd.f32 %v144_v36, %v143_v35 }
  0x3d   :  { %v147_v39 = vadd.f32 %v146_v37, %v145_v38 }
  0x3f   :  { %148 = vst.msk [vmem:[#allocation2] sm:$0xff] %vm92_vm0, %v147_v39 }
  0x46   :  { %v152_v40 = vld [vmem:[#allocation2] sm:$0xff] }
  0x47   :  { %v153_v41 = vsel %vm92_vm0, %v152_v40, 0.0 }
  0x48   :  { %154 = vadd.xlane.f32.xlu0 %v153_v41 }
  0xd5   :  { %v155_v42 = vpop.xlane.xlu0 %154 }
  0xd6   :  { %v156_v43 = vrot.slane %v155_v42, 4 }
  0xd8   :  { %v157_v44 = vadd.f32 %v156_v43, %v155_v42 }
  0xda   :  { %v158_v45 = vrot.slane %v157_v44, 2 }
  0xdc   :  { %v159_v46 = vadd.f32 %v158_v45, %v157_v44 }
  0xde   :  { %v160_v47 = vrot.slane %v159_v46, 1 }
  0xe0   :  { %v161_v48 = vadd.f32 %v160_v47, %v159_v46 }
  0xe2   :  { %188 = vpush %v161_v48 }
 0x113   :  { %s189_s1 = spop %188 }
 0x114   :  { %164 = sst [smem:[#allocation8]] %s189_s1 }
 0x115   :  { %242 = shalt.err (!%p239_p10)
}
 0x116   :  { %s261_s16 = smov [#allocation8]  }
 0x117   :  { %172 = dma.smem_to_hbm %s261_s16, 16, %s315_s2, [#allocation5]  }
 0x118   :  { %247 = dma.done.wait [#allocation5], 16  }
 0x119   :  { %248 = vsyncadd [#allocation5], 4294967280 }
 0x11a   :  { %176 = sfence }
 0x11b   :  { %177 = vsyncpa [#allocation4], 1 }
 0x11c   :  { %178 = vsyncpa [#allocation7], 1 }
 0x11d   :  { %179 = vsyncpa [#allocation5], 1 }

</bundles_post_ra>
